<compile_context>
chip_gen: v7x
topology: tpu7x:2x2x1
jax: 0.10.0
libtpu: 0.0.40
codegen_flags: <defaults>
</compile_context>

<pallas_src>
import jax
import jax.numpy as jnp
from jax.experimental import pallas as pl
from jax.experimental.pallas import tpu as pltpu


def _make_concat_kernel(c1w: int, c2w: int, tb: int, rem: int, num_chunks: int):
    """Kernel factory closing over static sizes.

    x_hbm : (N, c1w)        raw HBM ref (memory_space=pl.ANY)
    y_hbm : (N, c2w)        raw HBM ref
    o_hbm : (N, c1w + c2w)  raw HBM ref, written only via DMA
    sem   : 2 DMA semaphores (one per input stream)
    """

    def _copy_rows(x_hbm, y_hbm, o_hbm, sem, row0, nrows):
        cp_x = pltpu.make_async_copy(
            x_hbm.at[pl.ds(row0, nrows), :],
            o_hbm.at[pl.ds(row0, nrows), pl.ds(0, c1w)],
            sem.at[0],
        )
        cp_y = pltpu.make_async_copy(
            y_hbm.at[pl.ds(row0, nrows), :],
            o_hbm.at[pl.ds(row0, nrows), pl.ds(c1w, c2w)],
            sem.at[1],
        )
        cp_x.start()
        cp_y.start()
        cp_x.wait()
        cp_y.wait()

    def kernel(x_hbm, y_hbm, o_hbm, sem):
        i = pl.program_id(0)
        row0 = pl.multiple_of(i * tb, tb)

        if rem == 0:
            # All chunks are full-size.
            _copy_rows(x_hbm, y_hbm, o_hbm, sem, row0, tb)
        else:
            # Full chunks, then a statically-sized clamped last chunk (no OOB DMA).
            @pl.when(i < num_chunks - 1)
            def _():
                _copy_rows(x_hbm, y_hbm, o_hbm, sem, row0, tb)

            @pl.when(i == num_chunks - 1)
            def _():
                _copy_rows(x_hbm, y_hbm, o_hbm, sem, row0, rem)

    return kernel


def _pick_row_chunks(n: int, max_chunks: int = 8):
    """Split N rows into at most `max_chunks` contiguous chunks.

    Returns (tb, num_chunks, rem): full-chunk row count, number of grid steps,
    and size of the trailing partial chunk (0 if every chunk is full).
    Guarantees >= 2 chunks whenever n >= 2 (megacore sharding on v7x).
    """
    if n <= max_chunks:
        return 1, n, 0                       # one row per step
    tb = -(-n // max_chunks)                 # ceil(n / max_chunks)
    tb = -(-tb // 8) * 8                     # round up to a sublane multiple
    num_chunks = -(-n // tb)
    rem = n - (num_chunks - 1) * tb
    if rem == tb:
        rem = 0
    return tb, num_chunks, rem


def concat_dim1(x: jax.Array, y: jax.Array, *,
                min_pallas_bytes: int = 1 << 20) -> jax.Array:
    """Equivalent of torch.cat([x, y], dim=1) for NCHW tensors."""
    assert x.ndim == 4 and y.ndim == 4, "expects NCHW inputs"
    n, c1, h, w = x.shape
    n2, c2, h2, w2 = y.shape
    assert (n, h, w) == (n2, h2, w2), "non-concat dims must match"
    assert x.dtype == y.dtype, "dtypes must match"

    if c1 == 0:
        return y
    if c2 == 0:
        return x

    c1w = c1 * h * w
    c2w = c2 * h * w
    cw = c1w + c2w
    itemsize = jnp.dtype(x.dtype).itemsize

    # Pallas path requires a 128-lane-aligned concat boundary so the strided
    # HBM DMA into the output column range [c1w, cw) stays tile-aligned, and
    # enough data to be worth a custom-call boundary at all.
    aligned = (c1w % 128 == 0) and (c2w % 128 == 0)
    big_enough = n * cw * itemsize >= min_pallas_bytes
    if not (aligned and big_enough):
        # XLA's native concat is already at HBM roofline for these cases.
        return jnp.concatenate([x, y], axis=1)

    # Lane-dense 2D views.
    x2 = x.reshape(n, c1w)
    y2 = y.reshape(n, c2w)

    tb, num_chunks, rem = _pick_row_chunks(n)

    out2 = pl.pallas_call(
        _make_concat_kernel(c1w, c2w, tb, rem, num_chunks),
        out_shape=jax.ShapeDtypeStruct((n, cw), x.dtype),
        grid_spec=pltpu.PrefetchScalarGridSpec(
            num_scalar_prefetch=0,
            grid=(num_chunks,),
            in_specs=[
                pl.BlockSpec(memory_space=pl.ANY),    # x stays in HBM
                pl.BlockSpec(memory_space=pl.ANY),    # y stays in HBM
            ],
            out_specs=pl.BlockSpec(memory_space=pl.ANY),  # written via DMA only
            scratch_shapes=[pltpu.SemaphoreType.DMA((2,))],
        ),
        compiler_params=pltpu.CompilerParams(
            dimension_semantics=("parallel",),        # row chunks shard across TCs
        ),
        cost_estimate=pl.CostEstimate(
            flops=0,
            transcendentals=0,
            bytes_accessed=2 * n * cw * itemsize,     # read + write once
        ),
    )(x2, y2)

    return out2.reshape(n, c1 + c2, h, w)


if __name__ == "__main__":
    key = jax.random.PRNGKey(0)
    kx, ky, ka, kb = jax.random.split(key, 4)

    # Small NCHW inputs consistent with the module's forward (concat on dim=1).
    x = jax.random.normal(kx, (2, 4, 16, 16), dtype=jnp.float32)
    y = jax.random.normal(ky, (2, 6, 16, 16), dtype=jnp.float32)

    out = concat_dim1(x, y, min_pallas_bytes=0)      # force the Pallas path
    out = jax.block_until_ready(out)
    ref = jnp.concatenate([x, y], axis=1)
    assert out.shape == (2, 10, 16, 16)
    assert out.dtype == x.dtype
    assert bool(jnp.array_equal(out, ref))

    # Chunked grid with a trailing partial chunk (n=10 -> tb=8, rem=2).
    a = jax.random.normal(ka, (10, 4, 16, 16), dtype=jnp.float32)
    b = jax.random.normal(kb, (10, 2, 16, 16), dtype=jnp.float32)
    out2 = jax.block_until_ready(concat_dim1(a, b, min_pallas_bytes=0))
    assert bool(jnp.array_equal(out2, jnp.concatenate([a, b], axis=1)))

    # Misaligned concat boundary takes the XLA fallback path.
    c = jax.random.normal(ka, (2, 3, 5, 7), dtype=jnp.float32)
    d = jax.random.normal(kb, (2, 2, 5, 7), dtype=jnp.float32)
    out3 = jax.block_until_ready(concat_dim1(c, d, min_pallas_bytes=0))
    assert bool(jnp.array_equal(out3, jnp.concatenate([c, d], axis=1)))

    print("KERNEL_OK")
</pallas_src>

<mosaic_0001>
module attributes {stable_mosaic.version = 11 : i64} {
  func.func @kernel(%arg0: i32, %arg1: memref<2x1024xf32, #tpu.memory_space<any>>, %arg2: memref<2x1536xf32, #tpu.memory_space<any>>, %arg3: memref<2x2560xf32, #tpu.memory_space<any>>, %arg4: memref<2x!tpu.dma_semaphore, #tpu.memory_space<semaphore_mem>>) attributes {dimension_semantics = [#tpu.dimension_semantics<parallel>], iteration_bounds = array<i64: 2>, scalar_prefetch = 0 : i64, scratch_operands = 1 : i64, tpu.core_type = #tpu.core_type<tc>, window_params = [{}, {}, {}]} {
    %c1_i32 = arith.constant 1 : i32
    %0 = arith.muli %arg0, %c1_i32 : i32
    %1 = tpu.assume_multiple %0, 1 : i32
    %c0_i32 = arith.constant 0 : i32
    %c0_i32_0 = arith.constant 0 : i32
    %2 = tpu.memref_slice %arg1[%1, %c0_i32_0] : memref<2x1024xf32, #tpu.memory_space<any>> -> memref<1x1024xf32, #tpu.memory_space<any>>
    %c0_i32_1 = arith.constant 0 : i32
    %3 = tpu.memref_slice %arg3[%1, %c0_i32_1] : memref<2x2560xf32, #tpu.memory_space<any>> -> memref<1x1024xf32, #tpu.memory_space<any>>
    %4 = tpu.memref_slice %arg4[%c0_i32] : memref<2x!tpu.dma_semaphore, #tpu.memory_space<semaphore_mem>> -> memref<1x!tpu.dma_semaphore, #tpu.memory_space<semaphore_mem>>
    %5 = tpu.memref_squeeze %4 : memref<1x!tpu.dma_semaphore, #tpu.memory_space<semaphore_mem>> -> memref<!tpu.dma_semaphore, #tpu.memory_space<semaphore_mem>>
    tpu.enqueue_dma source(%2 : memref<1x1024xf32, #tpu.memory_space<any>>) target(%3 : memref<1x1024xf32, #tpu.memory_space<any>>) target_semaphore(%5 : memref<!tpu.dma_semaphore, #tpu.memory_space<semaphore_mem>>)
    %c1_i32_2 = arith.constant 1 : i32
    %c0_i32_3 = arith.constant 0 : i32
    %6 = tpu.memref_slice %arg2[%1, %c0_i32_3] : memref<2x1536xf32, #tpu.memory_space<any>> -> memref<1x1536xf32, #tpu.memory_space<any>>
    %c1024_i32 = arith.constant 1024 : i32
    %7 = tpu.memref_slice %arg3[%1, %c1024_i32] : memref<2x2560xf32, #tpu.memory_space<any>> -> memref<1x1536xf32, #tpu.memory_space<any>>
    %8 = tpu.memref_slice %arg4[%c1_i32_2] : memref<2x!tpu.dma_semaphore, #tpu.memory_space<semaphore_mem>> -> memref<1x!tpu.dma_semaphore, #tpu.memory_space<semaphore_mem>>
    %9 = tpu.memref_squeeze %8 : memref<1x!tpu.dma_semaphore, #tpu.memory_space<semaphore_mem>> -> memref<!tpu.dma_semaphore, #tpu.memory_space<semaphore_mem>>
    tpu.enqueue_dma source(%6 : memref<1x1536xf32, #tpu.memory_space<any>>) target(%7 : memref<1x1536xf32, #tpu.memory_space<any>>) target_semaphore(%9 : memref<!tpu.dma_semaphore, #tpu.memory_space<semaphore_mem>>)
    %c0_i32_4 = arith.constant 0 : i32
    %c0_i32_5 = arith.constant 0 : i32
    %10 = tpu.memref_slice %arg1[%1, %c0_i32_5] : memref<2x1024xf32, #tpu.memory_space<any>> -> memref<1x1024xf32, #tpu.memory_space<any>>
    %c0_i32_6 = arith.constant 0 : i32
    %11 = tpu.memref_slice %arg3[%1, %c0_i32_6] : memref<2x2560xf32, #tpu.memory_space<any>> -> memref<1x1024xf32, #tpu.memory_space<any>>
    %12 = tpu.memref_slice %arg4[%c0_i32_4] : memref<2x!tpu.dma_semaphore, #tpu.memory_space<semaphore_mem>> -> memref<1x!tpu.dma_semaphore, #tpu.memory_space<semaphore_mem>>
    %13 = tpu.memref_squeeze %12 : memref<1x!tpu.dma_semaphore, #tpu.memory_space<semaphore_mem>> -> memref<!tpu.dma_semaphore, #tpu.memory_space<semaphore_mem>>
    tpu.wait_dma2 semaphore(%13 : memref<!tpu.dma_semaphore, #tpu.memory_space<semaphore_mem>>) src(%10 : memref<1x1024xf32, #tpu.memory_space<any>>) dst(%11 : memref<1x1024xf32, #tpu.memory_space<any>>)
    %c1_i32_7 = arith.constant 1 : i32
    %c0_i32_8 = arith.constant 0 : i32
    %14 = tpu.memref_slice %arg2[%1, %c0_i32_8] : memref<2x1536xf32, #tpu.memory_space<any>> -> memref<1x1536xf32, #tpu.memory_space<any>>
    %c1024_i32_9 = arith.constant 1024 : i32
    %15 = tpu.memref_slice %arg3[%1, %c1024_i32_9] : memref<2x2560xf32, #tpu.memory_space<any>> -> memref<1x1536xf32, #tpu.memory_space<any>>
    %16 = tpu.memref_slice %arg4[%c1_i32_7] : memref<2x!tpu.dma_semaphore, #tpu.memory_space<semaphore_mem>> -> memref<1x!tpu.dma_semaphore, #tpu.memory_space<semaphore_mem>>
    %17 = tpu.memref_squeeze %16 : memref<1x!tpu.dma_semaphore, #tpu.memory_space<semaphore_mem>> -> memref<!tpu.dma_semaphore, #tpu.memory_space<semaphore_mem>>
    tpu.wait_dma2 semaphore(%17 : memref<!tpu.dma_semaphore, #tpu.memory_space<semaphore_mem>>) src(%14 : memref<1x1536xf32, #tpu.memory_space<any>>) dst(%15 : memref<1x1536xf32, #tpu.memory_space<any>>)
    return
  }
}

</mosaic_0001>

<bundles_post_ra>
// kernel: tpu_custom_call.1
= control target key start
LH: loop header
LB: loop body
LE: loop exit
PB: predicated region body
PF: predicated region fallthrough
CT: control target
= control target key end

     0   :  { %s167_s9 = smov 0   ;;  %s186_s0 = inlined_call_operand.hbm [shape: f32[2,1024], index: 0, kind: input, shape index: {}]   ;;  %s187_s1 = inlined_call_operand.hbm [shape: f32[2,1536], index: 1, kind: input, shape index: {}]   ;;  %s188_s2 = inlined_call_operand.hbm [shape: f32[2,2560], index: 2, kind: output, shape index: {}]  }
   0x1 LB: > { %s14_s10 = sshrl.u32 %s143_s9, 1  ;;  %s15_s11 = sand.u32 1, %s143_s9   ;;  %s143_s9 = sphi %s167_s9, %s12_s9  }
   0x2   : > { %s111_s12 = sshll.u32 %s14_s10, 4  ;;  %s20_s13 = smul.u32 40, %s14_s10 }
   0x3   : > { %s17_s14 = sadd.s32 %s111_s12, %s15_s11  ;;  %s145_s24 = smov 32  }
   0x4   : > { %s112_s15 = sshll.u32 %s17_s14, 4  ;;  %s21_s16 = sadd.s32 %s20_s13, %s15_s11 }
   0x5   : > { %s19_s19 = scalar_lea.hbm %s186_s0, %s112_s15  ;;  %s113_s20 = sshll.u32 %s21_s16, 4 }
   0x6   : > { %s23_s23 = scalar_lea.hbm %s188_s2, %s113_s20  ;;  %36 = sst [smem:[#allocation4]] %s145_s24 }
   0x7   : > { %38 = sst [smem:[#allocation4 + $0x1]] %s145_s24  ;;  %s146_s25 = smov 1  }
   0x8   : > { %40 = sst [smem:[#allocation4 + $0x2]] %s146_s25  ;;  %s147_s26 = smov [#allocation2]  }
   0x9   : > { %s148_s27 = smov [#allocation3]   ;;  %s149_s28 = smov 0  }
   0xa   : > { %42 = dma.general %s19_s19, 128, %s23_s23, %s147_s26, %s148_s27, [#allocation4], %s149_s28, 0  }
   0xb   : > { %s43_s29 = smul.u32 24, %s14_s10  ;;  %s105_s30 = scalar_lea.hbm %s23_s23, 256 }
   0xc   : > { %63 = sst [smem:[#allocation6]] %s145_s24  ;;  %s150_s8 = smov [#allocation2 + $0x1]  }
   0xd   : > { %65 = sst [smem:[#allocation6 + $0x1]] %s145_s24  ;;  %s44_s3 = sadd.s32 %s43_s29, %s15_s11 }
   0xe   : > { %67 = sst [smem:[#allocation6 + $0x2]] %s146_s25  ;;  %s114_s4 = sshll.u32 %s44_s3, 4 }
   0xf   : > { %s46_s7 = scalar_lea.hbm %s187_s1, %s114_s4  ;;  %s151_s12 = smov [#allocation5]  }
  0x10   : > { %69 = dma.general %s46_s7, 192, %s105_s30, %s150_s8, %s151_s12, [#allocation6], %s149_s28, 0  }
  0x11   : > { %137 = dma.done.wait [#allocation2], 128 }
  0x12   : > { %138 = vsyncadd [#allocation2], 4294967168 }
  0x13   : > { %139 = dma.done.wait [#allocation2 + $0x1], 192 }
  0x14   : > { %140 = vsyncadd [#allocation2 + $0x1], 4294967104  ;;  %s12_s9 = sadd.s32 1, %s143_s9  }
  0x15   : > { %p9_p0 = scmp.ge.s32.totalorder %s12_s9, 2  }
  0x17   :  { %11 = sbr.rel (!%p9_p0) target bundleno = 1 (0x1), region = 29 }
  0x1e   :  { %76 = vsyncmov [#allocation2] }
  0x21   :  { %s77_s10 = vpop.sfrf %76 }
  0x22   :  { %p116_p1 = scmp.ne.s32.totalorder %s77_s10, 0 }
  0x24   :  { %81 = shalt.err (%p116_p1)  }
  0x25   :  { %83 = vsyncmov [#allocation2 + $0x1] }
  0x28   :  { %s84_s11 = vpop.sfrf %83 }
  0x29   :  { %p117_p2 = scmp.ne.s32.totalorder %s84_s11, 0 }
  0x2b   :  { %88 = shalt.err (%p117_p2)  }

</bundles_post_ra>
